<compile_context>
chip_gen: v5e
topology: v5e:2x2
jax: 0.10.0
libtpu: 0.0.40
codegen_flags: <defaults>
</compile_context>

<pallas_src>
import jax
import jax.numpy as jnp
import numpy as np
from jax.experimental import pallas as pl
from jax.experimental.pallas import tpu as pltpu


# ----------------------------------------------------------------------------
# Kernel
# ----------------------------------------------------------------------------
def _hdl_kernel(logits_ref, fm_ref, lse_ref, dist_ref):
    x = logits_ref[...].astype(jnp.float32)        # (T, Cp)
    fm = fm_ref[...]                                # (T, Cp) float32
    t, cp = x.shape

    col = jax.lax.broadcasted_iota(jnp.int32, (t, cp), 1)

    # --- per-row logsumexp (gold-logit subtraction happens in the wrapper) ---
    row_max = jnp.max(x, axis=-1)                   # (T,)
    shifted = x - row_max[:, None]                  # (T, Cp)
    sum_exp = jnp.sum(jnp.exp(shifted), axis=-1)    # (T,)
    lse = jnp.log(sum_exp) + row_max                # (T,)

    # --- argmax prediction (first max, like np.argmax) -> factor gather ------
    is_max = x == row_max[:, None]
    pred_idx = jnp.min(jnp.where(is_max, col, cp), axis=-1)                 # (T,)
    dist = jnp.sum(jnp.where(col == pred_idx[:, None], fm, 0.0), axis=-1)   # (T,)

    # lane-dense stores: the rows of this tile live on the lane axis.
    lse_ref[...] = lse[None, :]
    dist_ref[...] = dist[None, :]


# ----------------------------------------------------------------------------
# Wrapper
# ----------------------------------------------------------------------------
def _round_up(x, m):
    return (x + m - 1) // m * m


def _choose_tile_n(n, c_pad, logits_itemsize):
    """Batch tile: large enough to pipeline, small enough that the two
    double-buffered (TILE_N, C_pad) input streams fit a v7x-safe VMEM budget."""
    budget = 20 * 1024 * 1024                          # bytes for streamed inputs
    per_row = 2 * c_pad * (logits_itemsize + 4)        # 2x buffers: logits + fm(f32)
    cap = max(128, min(1024, (budget // max(per_row, 1)) // 128 * 128))
    sub = 8 * max(1, 4 // max(logits_itemsize, 1))     # sublane granularity
    n_sub = _round_up(n, sub)
    if n_sub <= cap:
        return n_sub                                   # whole batch in one tile
    return cap                                         # multiple of 128 -> lane-dense outputs stay legal


def hierarchical_distance_loss(logits, labels, dis_matrix, lca_matrix, *,
                               lca=False, normalise=1.0):
    """Returns (total_loss scalar f32, distance_factor (N,) f32)."""
    n, c = logits.shape
    labels_i = labels.astype(jnp.int32)
    dis = dis_matrix.astype(jnp.float32)

    # Per-example factor rows; the full (C, C) table is never materialized.
    if lca:
        lca_rows = lca_matrix.astype(jnp.int32)[labels_i, :]                     # (N, C)
        fm_rows = jnp.take_along_axis(dis[labels_i, :], lca_rows, axis=1) + 0.5  # (N, C)
    else:
        fm_rows = dis[labels_i, :] + 0.5                                         # (N, C)

    # Trivial O(N) gold-logit gather (kernel keeps all the O(N*C) work).
    label_logit = jnp.take_along_axis(logits, labels_i[:, None], axis=1)[:, 0]
    label_logit = label_logit.astype(jnp.float32)

    # --- pad to TPU-friendly tiles -------------------------------------------
    c_pad = max(128, _round_up(c, 128))
    itemsize = jnp.dtype(logits.dtype).itemsize
    tile_n = _choose_tile_n(n, c_pad, itemsize)
    n_pad = _round_up(n, tile_n)
    num_tiles = n_pad // tile_n

    neg_fill = jnp.finfo(logits.dtype).min
    logits_p = jnp.pad(logits, ((0, n_pad - n), (0, c_pad - c)),
                       constant_values=neg_fill)                # native dtype kept
    fm_p = jnp.pad(fm_rows.astype(jnp.float32),
                   ((0, n_pad - n), (0, c_pad - c)))

    working = 2 * tile_n * c_pad * (itemsize + 4) + 16 * tile_n
    vmem_limit = int(min(64 * 2**20, max(32 * 2**20, 2 * working)))

    lse_out, dist_out = pl.pallas_call(
        _hdl_kernel,
        out_shape=(
            jax.ShapeDtypeStruct((1, n_pad), jnp.float32),   # per-row logsumexp
            jax.ShapeDtypeStruct((1, n_pad), jnp.float32),   # per-row distance factor
        ),
        grid=(num_tiles,),
        in_specs=[
            pl.BlockSpec((tile_n, c_pad), lambda i: (i, 0)),   # logits (native dtype)
            pl.BlockSpec((tile_n, c_pad), lambda i: (i, 0)),   # factor rows (f32)
        ],
        out_specs=(
            pl.BlockSpec((1, tile_n), lambda i: (0, i)),       # lane-dense
            pl.BlockSpec((1, tile_n), lambda i: (0, i)),       # lane-dense
        ),
        compiler_params=pltpu.CompilerParams(
            dimension_semantics=("parallel",),                 # batch tiles across TCs
            vmem_limit_bytes=vmem_limit,
        ),
    )(logits_p, fm_p)

    dist = dist_out[0, :n]
    ce = lse_out[0, :n] - label_logit                          # CE, reduction='none'
    total = jnp.mean(ce * dist) / jnp.float32(normalise)
    return total, dist


# ----------------------------------------------------------------------------
# Reference + test
# ----------------------------------------------------------------------------
def _reference(logits, labels, dis, lca_m, *, lca, normalise):
    """Plain numpy reference matching the PyTorch module."""
    logits = np.asarray(logits, np.float32)
    labels = np.asarray(labels)
    m = logits.max(axis=1, keepdims=True)
    lse = np.log(np.exp(logits - m).sum(axis=1)) + m[:, 0]
    ce = lse - logits[np.arange(len(labels)), labels]
    preds = np.argmax(logits, axis=1)
    if lca:
        factor = dis[labels, lca_m[labels, preds]] + 0.5
    else:
        factor = dis[labels, preds] + 0.5
    total = (ce * factor).mean() / normalise
    return total, factor


if __name__ == "__main__":
    # --- test 1: LCA path ----------------------------------------------------
    N, C = 8, 16
    key = jax.random.PRNGKey(0)
    k_logits, k_labels = jax.random.split(key)
    logits = jax.random.normal(k_logits, (N, C), dtype=jnp.float32)
    labels = jax.random.randint(k_labels, (N,), 0, C, dtype=jnp.int32)

    # Deterministic synthetic hierarchy matrices (module would build these from
    # `hierarchy.get_dis_lca_matrix()`): tree-like distance and LCA proxies.
    ii = np.arange(C)
    dis_matrix = jnp.asarray(np.abs(ii[:, None] - ii[None, :]), jnp.float32)   # (C, C)
    lca_matrix = jnp.asarray(np.minimum(ii[:, None], ii[None, :]), jnp.int32)  # (C, C)

    total, factor = hierarchical_distance_loss(
        logits, labels, dis_matrix, lca_matrix, lca=True, normalise=2.0)
    jax.block_until_ready((total, factor))

    ref_total, ref_factor = _reference(
        np.asarray(logits), np.asarray(labels),
        np.asarray(dis_matrix), np.asarray(lca_matrix), lca=True, normalise=2.0)
    assert np.allclose(np.asarray(total), ref_total, rtol=1e-5, atol=1e-5)
    assert np.allclose(np.asarray(factor), ref_factor, rtol=1e-5, atol=1e-5)

    # --- test 2: non-LCA path, ragged shapes (exercise row + lane padding) ----
    N2, C2 = 5, 7
    k2a, k2b = jax.random.split(jax.random.PRNGKey(1))
    logits2 = jax.random.normal(k2a, (N2, C2), dtype=jnp.float32)
    labels2 = jax.random.randint(k2b, (N2,), 0, C2, dtype=jnp.int32)
    jj = np.arange(C2)
    dis2 = jnp.asarray(np.abs(jj[:, None] - jj[None, :]), jnp.float32)
    lca2 = jnp.asarray(np.minimum(jj[:, None], jj[None, :]), jnp.int32)

    total2, factor2 = hierarchical_distance_loss(
        logits2, labels2, dis2, lca2, lca=False, normalise=1.0)
    jax.block_until_ready((total2, factor2))

    ref_total2, ref_factor2 = _reference(
        np.asarray(logits2), np.asarray(labels2),
        np.asarray(dis2), np.asarray(lca2), lca=False, normalise=1.0)
    assert np.allclose(np.asarray(total2), ref_total2, rtol=1e-5, atol=1e-5)
    assert np.allclose(np.asarray(factor2), ref_factor2, rtol=1e-5, atol=1e-5)

    print("KERNEL_OK")
</pallas_src>

<mosaic_0001>
module attributes {stable_mosaic.version = 11 : i64} {
  func.func @_hdl_kernel(%arg0: i32, %arg1: memref<8x128xf32, #tpu.memory_space<vmem>>, %arg2: memref<8x128xf32, #tpu.memory_space<vmem>>, %arg3: memref<1x8xf32, #tpu.memory_space<vmem>>, %arg4: memref<1x8xf32, #tpu.memory_space<vmem>>) attributes {dimension_semantics = [#tpu.dimension_semantics<parallel>], iteration_bounds = array<i64: 1>, scalar_prefetch = 0 : i64, scratch_operands = 0 : i64, tpu.core_type = #tpu.core_type<tc>, window_params = [{transform_indices = @transform_0, window_bounds = array<i64: 8, 128>}, {transform_indices = @transform_1, window_bounds = array<i64: 8, 128>}, {transform_indices = @transform_2, window_bounds = array<i64: 1, 8>}, {transform_indices = @transform_3, window_bounds = array<i64: 1, 8>}]} {
    %c0 = arith.constant 0 : index
    %c0_0 = arith.constant 0 : index
    %0 = vector.load %arg1[%c0, %c0_0] : memref<8x128xf32, #tpu.memory_space<vmem>>, vector<8x128xf32>
    %c0_1 = arith.constant 0 : index
    %c0_2 = arith.constant 0 : index
    %1 = vector.load %arg2[%c0_1, %c0_2] : memref<8x128xf32, #tpu.memory_space<vmem>>, vector<8x128xf32>
    %2 = tpu.iota {dimensions = array<i32: 1>} : vector<8x128xi32>
    %cst = arith.constant dense<0xFF800000> : vector<8xf32>
    %3 = vector.multi_reduction <maximumf>, %0, %cst [1] : vector<8x128xf32> to vector<8xf32>
    %4 = vector.shape_cast %3 : vector<8xf32> to vector<8x1xf32>
    %5 = vector.broadcast %4 : vector<8x1xf32> to vector<8x128xf32>
    %6 = arith.subf %0, %5 : vector<8x128xf32>
    %7 = math.exp %6 : vector<8x128xf32>
    %cst_3 = arith.constant dense<0.000000e+00> : vector<8xf32>
    %8 = vector.multi_reduction <add>, %7, %cst_3 [1] : vector<8x128xf32> to vector<8xf32>
    %9 = math.log %8 : vector<8xf32>
    %10 = arith.addf %9, %3 : vector<8xf32>
    %11 = vector.shape_cast %3 : vector<8xf32> to vector<8x1xf32>
    %12 = vector.broadcast %11 : vector<8x1xf32> to vector<8x128xf32>
    %13 = arith.cmpf oeq, %0, %12 : vector<8x128xf32>
    %c128_i32 = arith.constant 128 : i32
    %14 = vector.broadcast %c128_i32 : i32 to vector<8x128xi32>
    %15 = arith.select %13, %2, %14 : vector<8x128xi1>, vector<8x128xi32>
    %cst_4 = arith.constant dense<2147483647> : vector<8xi32>
    %16 = vector.multi_reduction <minsi>, %15, %cst_4 [1] : vector<8x128xi32> to vector<8xi32>
    %17 = vector.shape_cast %16 : vector<8xi32> to vector<8x1xi32>
    %18 = vector.broadcast %17 : vector<8x1xi32> to vector<8x128xi32>
    %19 = arith.cmpi eq, %2, %18 : vector<8x128xi32>
    %cst_5 = arith.constant 0.000000e+00 : f32
    %20 = vector.broadcast %cst_5 : f32 to vector<8x128xf32>
    %21 = arith.select %19, %1, %20 : vector<8x128xi1>, vector<8x128xf32>
    %cst_6 = arith.constant dense<0.000000e+00> : vector<8xf32>
    %22 = vector.multi_reduction <add>, %21, %cst_6 [1] : vector<8x128xf32> to vector<8xf32>
    %23 = vector.shape_cast %10 : vector<8xf32> to vector<1x8xf32>
    %c0_7 = arith.constant 0 : index
    %c0_8 = arith.constant 0 : index
    %24 = vector.load %arg3[%c0_7, %c0_8] : memref<1x8xf32, #tpu.memory_space<vmem>>, vector<1x8xf32>
    tpu.vector_store %arg3[%c0_7, %c0_8], %23 {strides = array<i32>} : memref<1x8xf32, #tpu.memory_space<vmem>>, vector<1x8xf32>,
    %25 = vector.shape_cast %22 : vector<8xf32> to vector<1x8xf32>
    %c0_9 = arith.constant 0 : index
    %c0_10 = arith.constant 0 : index
    %26 = vector.load %arg4[%c0_9, %c0_10] : memref<1x8xf32, #tpu.memory_space<vmem>>, vector<1x8xf32>
    tpu.vector_store %arg4[%c0_9, %c0_10], %25 {strides = array<i32>} : memref<1x8xf32, #tpu.memory_space<vmem>>, vector<1x8xf32>,
    return
  }
  func.func @transform_0(%arg0: i32) -> (i32, i32) {
    %c0_i32 = arith.constant 0 : i32
    %c0_i32_0 = arith.constant 0 : i32
    return %arg0, %c0_i32 : i32, i32
  }
  func.func @transform_1(%arg0: i32) -> (i32, i32) {
    %c0_i32 = arith.constant 0 : i32
    %c0_i32_0 = arith.constant 0 : i32
    return %arg0, %c0_i32 : i32, i32
  }
  func.func @transform_2(%arg0: i32) -> (i32, i32) {
    %c0_i32 = arith.constant 0 : i32
    %c0_i32_0 = arith.constant 0 : i32
    return %c0_i32, %arg0 : i32, i32
  }
  func.func @transform_3(%arg0: i32) -> (i32, i32) {
    %c0_i32 = arith.constant 0 : i32
    %c0_i32_0 = arith.constant 0 : i32
    return %c0_i32, %arg0 : i32, i32
  }
}

</mosaic_0001>

<bundles_post_ra>
// kernel: tpu_custom_call.1
= control target key start
LH: loop header
LB: loop body
LE: loop exit
PB: predicated region body
PF: predicated region fallthrough
CT: control target
= control target key end

     0   :  { %9 = vsyncpa [#allocation3], 0  ;;  %s268_s0 = inlined_call_operand.hbm [shape: f32[8,128], index: 0, kind: input, shape index: {}]   ;;  %s269_s1 = inlined_call_operand.hbm [shape: f32[8,128], index: 1, kind: input, shape index: {}]   ;;  %s270_s2 = inlined_call_operand.hbm [shape: f32[1,8], index: 2, kind: output, shape index: {0}]   ;;  %s271_s3 = inlined_call_operand.hbm [shape: f32[1,8], index: 3, kind: output, shape index: {1}]  }
   0x1   :  { %10 = vsyncpa [#allocation6], 0 }
   0x2   :  { %11 = vsyncpa [#allocation4], 0 }
   0x3   :  { %12 = vsyncpa [#allocation9], 0  ;;  %s18_s14 = sshll.u32 %s268_s0, 4  ;;  %s232_s15 = smov [#allocation2]   ;;  %s19_s14 = int_to_ptr.hbm [resolvable:$true] %s18_s14 }
   0x4   :  { %s20_s16 = sshll.u32 %s232_s15, 4  ;;  %s29_s19 = sshll.u32 %s269_s1, 4  ;;  %s21_s16 = int_to_ptr.vmem [resolvable:$true] %s20_s16  ;;  %s30_s19 = int_to_ptr.hbm [resolvable:$true] %s29_s19 }
   0x5   :  { %23 = dma.hbm_to_vmem [thread:$0]  %s19_s14, 128, %s21_s16, [#allocation3]  }
   0x6   :  { %s233_s20 = smov [#allocation5]  }
   0x7   :  { %s31_s21 = sshll.u32 %s233_s20, 4  ;;  %s32_s21 = int_to_ptr.vmem [resolvable:$true] %s31_s21 }
   0x8   :  { %34 = dma.hbm_to_vmem [thread:$0]  %s30_s19, 128, %s32_s21, [#allocation6]  }
   0x9   :  { %224 = dma.done.wait [#allocation3], 128  }
   0xa   :  { %225 = vsyncadd [#allocation3], 4294967168 }
   0xb   :  { %226 = dma.done.wait [#allocation6], 128  }
   0xc   :  { %227 = vsyncadd [#allocation6], 4294967168  ;;  %v43_v0 = vld [vmem:[#allocation2] sm:$0xff]  ;;  %v45_v1 = vlaneseq  ;;  %v44_v19 = vld [vmem:[#allocation5] sm:$0xff]  ;;  %s234_s0 = smov [#allocation7]   ;;  %s93_s24 = sshll.u32 %s270_s2, 4  ;;  %s94_s24 = int_to_ptr.hbm [resolvable:$true] %s93_s24 }
   0xd   :  { %47 = vmax.xlane.f32.xlu0 %v43_v0  ;;  %s91_s1 = sshll.u32 %s234_s0, 4  ;;  %vm80_vm3 = vcmask 57344   ;;  %s235_s25 = smov [#allocation8]   ;;  %s92_s1 = int_to_ptr.vmem [resolvable:$true] %s91_s1 }
   0xe   :  { %v46_v2 = vand.u32 127, %v45_v1  ;;  %s102_s26 = sshll.u32 %s235_s25, 4  ;;  %s104_s29 = sshll.u32 %s271_s3, 4  ;;  %s103_s26 = int_to_ptr.vmem [resolvable:$true] %s102_s26  ;;  %s105_s29 = int_to_ptr.hbm [resolvable:$true] %s104_s29 }
  0x80   :  { %v48_v3 = vpop.xlane.xlu0 %47 }
  0x81   :  { %vm57_vm0 = vcmp.eq.f32.partialorder %v43_v0, %v48_v3  ;;  %v49_v7 = vsub.f32 %v43_v0, %v48_v3 }
  0x82   :  { %v58_v4 = vsel %vm57_vm0, %v46_v2, 128 }
  0x83   :  { %v60_v5 = vshra.s32 %v58_v4, 16  ;;  %v59_v8 = vand.u32 65535, %v58_v4  ;;  %v50_v9 = vmul.f32 1.442695, %v49_v7 }
  0x85   :  { %v62_v6 = vcvt.s32.f32 %v60_v5  ;;  %v61_v11 = vcvt.s32.f32 %v59_v8  ;;  %124 = vpow2.f32 %v50_v9 }
  0x87   :  { %63 = vmin.xlane.f32.xlu0 %v62_v6 }
  0x8b   :  { %v125_v13 = vpop.eup %124 }
  0xfa   :  { %v64_v10 = vpop.xlane.xlu0 %63 }
  0xfb   :  { %vm65_vm1 = vcmp.eq.f32.partialorder %v62_v6, %v64_v10  ;;  %v70_v14 = vcvt.f32.s32 %v64_v10 }
  0xfc   :  { %v66_v12 = vsel %vm65_vm1, %v61_v11, inf }
  0xfd   :  { %67 = vmin.xlane.f32.xlu1 %v66_v12  ;;  %v71_v16 = vshll.u32 %v70_v14, 16 }
 0x105   :  { %52 = vadd.xlane.f32.xlu1 %v125_v13 }
 0x170   :  { %v68_v15 = vpop.xlane.xlu1 %67 }
 0x171   :  { %v69_v17 = vcvt.f32.s32 %v68_v15 }
 0x173   :  { %v72_v18 = vadd.s32 %v71_v16, %v69_v17 }
 0x175   :  { %vm73_vm2 = vcmp.eq.s32.totalorder %v46_v2, %v72_v18 }
 0x176   :  { %v74_v20 = vsel %vm73_vm2, %v44_v19, 0.0 }
 0x177   :  { %75 = vadd.xlane.f32.xlu2 %v74_v20 }
 0x178   :  { %v53_v21 = vpop.xlane.xlu1 %52 }
 0x179   :  { %126 = vlog2.f32 %v53_v21 }
 0x17f   :  { %v127_v22 = vpop.eup %126 }
 0x180   :  { %v55_v23 = vmul.f32 0.6931472, %v127_v22 }
 0x182   :  { %v56_v24 = vadd.f32 %v55_v23, %v48_v3 }
 0x184   :  { %v78_v25 = vperm.slane %v56_v24, %v46_v2 }
 0x186   :  { %81 = vst.msk [vmem:[#allocation7] sm:$0x1] %vm80_vm3, %v78_v25 }
 0x187   :  { %96 = dma.vmem_to_hbm [thread:$0]  %s92_s1, 16, %s94_s24, [#allocation4]  }
 0x1ea   :  { %v76_v26 = vpop.xlane.xlu2 %75 }
 0x1eb   :  { %v83_v27 = vperm.slane %v76_v26, %v46_v2 }
 0x1ed   :  { %85 = vst.msk [vmem:[#allocation8] sm:$0x1] %vm80_vm3, %v83_v27 }
 0x1ee   :  { %107 = dma.vmem_to_hbm [thread:$0]  %s103_s26, 16, %s105_s29, [#allocation9]  }
 0x1ef   :  { %228 = dma.done.wait [#allocation4], 16  }
 0x1f0   :  { %229 = vsyncadd [#allocation4], 4294967280 }
 0x1f1   :  { %230 = dma.done.wait [#allocation9], 16  }
 0x1f2   :  { %231 = vsyncadd [#allocation9], 4294967280 }
 0x1f3   :  { %116 = vsyncpa [#allocation3], 1 }
 0x1f4   :  { %117 = vsyncpa [#allocation6], 1 }
 0x1f5   :  { %118 = vsyncpa [#allocation4], 1 }
 0x1f6   :  { %119 = vsyncpa [#allocation9], 1 }

</bundles_post_ra>
